<compile_context>
chip_gen: v7x
topology: tpu7x:2x2x1
jax: 0.10.0
libtpu: 0.0.40
codegen_flags: <defaults>
</compile_context>

<pallas_src>
import functools
import math

import jax
import jax.numpy as jnp
from jax import lax
from jax.experimental import pallas as pl
from jax.experimental.pallas import tpu as pltpu


def _round_up(x: int, m: int) -> int:
    return ((x + m - 1) // m) * m


def _vmem_capacity_bytes() -> int:
    """Per-core VMEM capacity; conservative v7x default if the query fails."""
    try:
        cap = getattr(pltpu.get_tpu_info(), "vmem_capacity_bytes", None)
        if cap:
            return int(cap)
    except Exception:
        pass
    return 64 * 1024 * 1024


def _select_tiles(seq_len: int, vmem_cap: int):
    """Returns (Tq, Tkv, Sp). Generation-aware: bigger tiles on 128 MiB parts."""
    s8 = _round_up(seq_len, 8)
    big_vmem = vmem_cap >= 96 * 1024 * 1024          # v5e / v6e (128 MiB VMEM)
    single_tile_max = 1024 if big_vmem else 512      # v7x (64 MiB VMEM)
    if s8 <= single_tile_max:
        return s8, s8, s8
    if big_vmem:
        tq, tkv = 512, 1024
    else:
        tq, tkv = 256, 512
    sp = _round_up(seq_len, tkv)                     # tkv is a multiple of tq
    return tq, tkv, sp


# ----------------------------------------------------------------------------
# Kernel 1: fused Q/K/V projection (lane-dense [Fp, 3*Hp] weight slab).
# ----------------------------------------------------------------------------
def _qkv_proj_kernel(x_ref, w_ref, b_ref, o_ref):
    x = x_ref[0]                                              # (Tp, Fp)
    y = jnp.dot(x, w_ref[...],
                preferred_element_type=jnp.float32) + b_ref[...]
    o_ref[0] = y.astype(o_ref.dtype)


# ----------------------------------------------------------------------------
# Kernel 2: flash-style attention with online softmax.
# ----------------------------------------------------------------------------
def _flash_attn_kernel(q_ref, k_ref, v_ref, o_ref, m_sc, l_sc, acc_sc,
                       *, seq_len: int, scale: float, mask_kv: bool):
    ki = pl.program_id(2)
    nkv = pl.num_programs(2)

    @pl.when(ki == 0)
    def _init():
        m_sc[...] = jnp.full_like(m_sc, -jnp.inf)
        l_sc[...] = jnp.zeros_like(l_sc)
        acc_sc[...] = jnp.zeros_like(acc_sc)

    q = q_ref[0]                                              # (Tq, Hp)  cdtype
    k = k_ref[0]                                              # (Tkv, Hp) cdtype
    v = v_ref[0]                                              # (Tkv, Hp) cdtype

    # Scores: contract the hidden axis directly (no k.T materialization);
    # operands stay in the storage dtype, accumulation in f32.
    s = lax.dot_general(q, k,
                        dimension_numbers=(((1,), (1,)), ((), ())),
                        preferred_element_type=jnp.float32) * scale  # (Tq, Tkv)

    if mask_kv:
        tkv = s.shape[-1]
        kv_ids = ki * tkv + lax.broadcasted_iota(jnp.int32, (1, tkv), 1)
        s = jnp.where(kv_ids < seq_len, s, -1e30)

    # Online softmax update (f32 state).
    m_new = jnp.maximum(m_sc[...], jnp.max(s, axis=-1, keepdims=True))
    alpha = jnp.exp(m_sc[...] - m_new)
    p = jnp.exp(s - m_new)
    l_sc[...] = alpha * l_sc[...] + jnp.sum(p, axis=-1, keepdims=True)
    acc_sc[...] = alpha * acc_sc[...] + jnp.dot(
        p.astype(v.dtype), v, preferred_element_type=jnp.float32)
    m_sc[...] = m_new

    @pl.when(ki == nkv - 1)
    def _finalize():
        # Exact divide (runs once per q tile; avoids approx-reciprocal error).
        o_ref[0] = (acc_sc[...] / l_sc[...]).astype(o_ref.dtype)


# ----------------------------------------------------------------------------
# Parameter prep (call once; hoisted out of the per-forward path).
# ----------------------------------------------------------------------------
def prepare_fused_qkv(wq, bq, wk, bk, wv, bv):
    """Pad to lane-dense (Fp, Hp) and fuse into [Fp, 3*Hp] / [1, 3*Hp]."""
    f, h = wq.shape
    fp = _round_up(f, 128)
    hp = _round_up(h, 128)

    def pad_w(w):
        return jnp.zeros((fp, hp), w.dtype).at[:f, :h].set(w)

    def pad_b(b):
        b = jnp.reshape(b, (1, -1))
        return jnp.zeros((1, hp), b.dtype).at[:, :h].set(b)

    w_qkv = jnp.concatenate([pad_w(wq), pad_w(wk), pad_w(wv)], axis=1)
    b_qkv = jnp.concatenate([pad_b(bq), pad_b(bk), pad_b(bv)], axis=1)
    return w_qkv, b_qkv


# ----------------------------------------------------------------------------
# Forward pass with pre-fused parameters.
# ----------------------------------------------------------------------------
def attention_pallas_fused(x, w_qkv, b_qkv, *, in_features, hidden_dim,
                           compute_dtype=None):
    """x: [B, S, F]; w_qkv: [Fp, 3*Hp]; b_qkv: [1, 3*Hp] -> [B, S, H]."""
    B, S, F = x.shape
    assert F == in_features
    H = hidden_dim
    dtype = x.dtype
    cdtype = compute_dtype if compute_dtype is not None else dtype

    Fp = w_qkv.shape[0]
    Hp = w_qkv.shape[1] // 3

    vmem_cap = _vmem_capacity_bytes()
    Tq, Tkv, Sp = _select_tiles(S, vmem_cap)
    vmem_limit = min(vmem_cap * 3 // 4, 96 * 1024 * 1024)

    # Skip the extra HBM pass over x when no padding is needed.
    if Sp == S and Fp == F:
        xp = x
    else:
        xp = jnp.zeros((B, Sp, Fp), dtype).at[:, :S, :F].set(x)

    # --- Kernel 1: fused QKV projection -> [B, Sp, 3*Hp] in compute dtype ---
    Tp = Tq
    n_proj = Sp // Tp
    qkv = pl.pallas_call(
        _qkv_proj_kernel,
        out_shape=jax.ShapeDtypeStruct((B, Sp, 3 * Hp), cdtype),
        grid_spec=pltpu.PrefetchScalarGridSpec(
            num_scalar_prefetch=0,
            grid=(B, n_proj),
            in_specs=[
                pl.BlockSpec((1, Tp, Fp), lambda b, i: (b, i, 0)),
                # Constant-index blocks: single-buffered to save VMEM.
                pl.BlockSpec((Fp, 3 * Hp), lambda b, i: (0, 0),
                             pipeline_mode=pl.Buffered(buffer_count=1)),
                pl.BlockSpec((1, 3 * Hp), lambda b, i: (0, 0),
                             pipeline_mode=pl.Buffered(buffer_count=1)),
            ],
            out_specs=pl.BlockSpec((1, Tp, 3 * Hp), lambda b, i: (b, i, 0)),
        ),
        compiler_params=pltpu.CompilerParams(
            dimension_semantics=("parallel", "parallel"),
            vmem_limit_bytes=vmem_limit,
        ),
    )(xp, w_qkv, b_qkv)

    # --- Kernel 2: flash attention over Q/K/V tiles of the qkv slab ---
    nq = Sp // Tq
    nkv = Sp // Tkv
    kernel = functools.partial(
        _flash_attn_kernel,
        seq_len=S,
        scale=1.0 / math.sqrt(float(H)),   # scale uses the ORIGINAL hidden dim
        mask_kv=(Sp != S),
    )

    out_p = pl.pallas_call(
        kernel,
        out_shape=jax.ShapeDtypeStruct((B, Sp, Hp), dtype),
        grid_spec=pltpu.PrefetchScalarGridSpec(
            num_scalar_prefetch=0,
            grid=(B, nq, nkv),
            in_specs=[
                # Q / K / V views of the same [B, Sp, 3*Hp] array, selected by
                # the last-dim block index (0 / 1 / 2).
                pl.BlockSpec((1, Tq, Hp), lambda b, qi, ki: (b, qi, 0)),
                pl.BlockSpec((1, Tkv, Hp), lambda b, qi, ki: (b, ki, 1)),
                pl.BlockSpec((1, Tkv, Hp), lambda b, qi, ki: (b, ki, 2)),
            ],
            out_specs=pl.BlockSpec((1, Tq, Hp), lambda b, qi, ki: (b, qi, 0)),
            scratch_shapes=[
                pltpu.VMEM((Tq, 1), jnp.float32),    # running max
                pltpu.VMEM((Tq, 1), jnp.float32),    # running denom
                pltpu.VMEM((Tq, Hp), jnp.float32),   # output accumulator
            ],
        ),
        compiler_params=pltpu.CompilerParams(
            dimension_semantics=("parallel", "parallel", "arbitrary"),
            vmem_limit_bytes=vmem_limit,
        ),
    )(qkv, qkv, qkv)

    return out_p[:, :S, :H]


def attention_pallas(x, wq, bq, wk, bk, wv, bv, compute_dtype=None):
    """Convenience wrapper: fuses/pads params and runs the forward pass."""
    F, H = wq.shape
    w_qkv, b_qkv = prepare_fused_qkv(wq, bq, wk, bk, wv, bv)
    return attention_pallas_fused(x, w_qkv, b_qkv, in_features=F,
                                  hidden_dim=H, compute_dtype=compute_dtype)


def attention_ref(x, wq, bq, wk, bk, wv, bv):
    """Pure-JAX reference mirroring the PyTorch forward."""
    q = x @ wq + bq
    k = x @ wk + bk
    v = x @ wv + bv
    scores = (q @ jnp.swapaxes(k, -1, -2)) / jnp.sqrt(
        jnp.asarray(q.shape[-1], jnp.float32))
    w = jax.nn.softmax(scores, axis=-1)
    return w @ v


if __name__ == "__main__":
    B, S, F, H = 2, 8, 16, 32

    key = jax.random.PRNGKey(0)
    kx, kwq, kbq, kwk, kbk, kwv, kbv = jax.random.split(key, 7)

    x = jax.random.normal(kx, (B, S, F), dtype=jnp.float32)

    # Deterministic parameter init (nn.Linear-like uniform scale).
    bound = 1.0 / math.sqrt(F)
    wq = jax.random.uniform(kwq, (F, H), jnp.float32, -bound, bound)
    bq = jax.random.uniform(kbq, (1, H), jnp.float32, -bound, bound)
    wk = jax.random.uniform(kwk, (F, H), jnp.float32, -bound, bound)
    bk = jax.random.uniform(kbk, (1, H), jnp.float32, -bound, bound)
    wv = jax.random.uniform(kwv, (F, H), jnp.float32, -bound, bound)
    bv = jax.random.uniform(kbv, (1, H), jnp.float32, -bound, bound)

    # Fused/padded parameters are prepared ONCE, outside the jitted forward.
    w_qkv, b_qkv = prepare_fused_qkv(wq, bq, wk, bk, wv, bv)
    attn = jax.jit(functools.partial(attention_pallas_fused,
                                     in_features=F, hidden_dim=H))

    out = jax.block_until_ready(attn(x, w_qkv, b_qkv))

    ref = attention_ref(x, wq, bq, wk, bk, wv, bv)
    assert out.shape == (B, S, H)
    assert jnp.allclose(out, ref, atol=2e-4, rtol=2e-4), "mismatch vs reference"

    print("KERNEL_OK")
</pallas_src>

<mosaic_0001>
module attributes {stable_mosaic.version = 11 : i64} {
  func.func @_flash_attn_kernel(%arg0: i32, %arg1: i32, %arg2: i32, %arg3: memref<1x8x128xf32, #tpu.memory_space<vmem>>, %arg4: memref<1x8x128xf32, #tpu.memory_space<vmem>>, %arg5: memref<1x8x128xf32, #tpu.memory_space<vmem>>, %arg6: memref<1x8x128xf32, #tpu.memory_space<vmem>>, %arg7: memref<8x1xf32, #tpu.memory_space<vmem>>, %arg8: memref<8x1xf32, #tpu.memory_space<vmem>>, %arg9: memref<8x128xf32, #tpu.memory_space<vmem>>) attributes {dimension_semantics = [#tpu.dimension_semantics<parallel>, #tpu.dimension_semantics<parallel>, #tpu.dimension_semantics<arbitrary>], iteration_bounds = array<i64: 2, 1, 1>, scalar_prefetch = 0 : i64, scratch_operands = 3 : i64, tpu.core_type = #tpu.core_type<tc>, window_params = [{transform_indices = @transform_0, window_bounds = array<i64: 1, 8, 128>}, {transform_indices = @transform_1, window_bounds = array<i64: 1, 8, 128>}, {transform_indices = @transform_2, window_bounds = array<i64: 1, 8, 128>}, {transform_indices = @transform_3, window_bounds = array<i64: 1, 8, 128>}]} {
    %c0_i32 = arith.constant 0 : i32
    %0 = arith.cmpi eq, %arg2, %c0_i32 : i32
    %1 = arith.extui %0 : i1 to i32
    %c0_i32_0 = arith.constant 0 : i32
    %2 = arith.cmpi ne, %1, %c0_i32_0 : i32
    scf.if %2 {
      %cst_29 = arith.constant 0xFF800000 : f32
      %38 = vector.broadcast %cst_29 : f32 to vector<8x1xf32>
      %c0_30 = arith.constant 0 : index
      %c0_31 = arith.constant 0 : index
      %39 = vector.load %arg7[%c0_30, %c0_31] : memref<8x1xf32, #tpu.memory_space<vmem>>, vector<8x1xf32>
      tpu.vector_store %arg7[%c0_30, %c0_31], %38 {strides = array<i32>} : memref<8x1xf32, #tpu.memory_space<vmem>>, vector<8x1xf32>,
      %cst_32 = arith.constant 0.000000e+00 : f32
      %40 = vector.broadcast %cst_32 : f32 to vector<8x1xf32>
      %c0_33 = arith.constant 0 : index
      %c0_34 = arith.constant 0 : index
      %41 = vector.load %arg8[%c0_33, %c0_34] : memref<8x1xf32, #tpu.memory_space<vmem>>, vector<8x1xf32>
      tpu.vector_store %arg8[%c0_33, %c0_34], %40 {strides = array<i32>} : memref<8x1xf32, #tpu.memory_space<vmem>>, vector<8x1xf32>,
      %cst_35 = arith.constant 0.000000e+00 : f32
      %42 = vector.broadcast %cst_35 : f32 to vector<8x128xf32>
      %c0_36 = arith.constant 0 : index
      %c0_37 = arith.constant 0 : index
      %43 = vector.load %arg9[%c0_36, %c0_37] : memref<8x128xf32, #tpu.memory_space<vmem>>, vector<8x128xf32>
      tpu.vector_store %arg9[%c0_36, %c0_37], %42 {strides = array<i32>} : memref<8x128xf32, #tpu.memory_space<vmem>>, vector<8x128xf32>,
    } else {
    }
    %c0 = arith.constant 0 : index
    %c0_1 = arith.constant 0 : index
    %c0_2 = arith.constant 0 : index
    %3 = vector.load %arg3[%c0, %c0_1, %c0_2] : memref<1x8x128xf32, #tpu.memory_space<vmem>>, vector<1x8x128xf32>
    %4 = vector.shape_cast %3 : vector<1x8x128xf32> to vector<8x128xf32>
    %c0_3 = arith.constant 0 : index
    %c0_4 = arith.constant 0 : index
    %c0_5 = arith.constant 0 : index
    %5 = vector.load %arg4[%c0_3, %c0_4, %c0_5] : memref<1x8x128xf32, #tpu.memory_space<vmem>>, vector<1x8x128xf32>
    %6 = vector.shape_cast %5 : vector<1x8x128xf32> to vector<8x128xf32>
    %c0_6 = arith.constant 0 : index
    %c0_7 = arith.constant 0 : index
    %c0_8 = arith.constant 0 : index
    %7 = vector.load %arg5[%c0_6, %c0_7, %c0_8] : memref<1x8x128xf32, #tpu.memory_space<vmem>>, vector<1x8x128xf32>
    %8 = vector.shape_cast %7 : vector<1x8x128xf32> to vector<8x128xf32>
    %cst = arith.constant dense<0.000000e+00> : vector<8x8xf32>
    %9 = tpu.matmul %4, %6, %cst {dimension_numbers = #tpu.dot_dimension_numbers<[1], [1], [0], [0], [0, 0, 1, 0], [], []>} : vector<8x128xf32>, vector<8x128xf32>, vector<8x8xf32> -> vector<8x8xf32>
    %cst_9 = arith.constant 0.176776692 : f32
    %10 = vector.broadcast %cst_9 : f32 to vector<8x8xf32>
    %11 = arith.mulf %9, %10 : vector<8x8xf32>
    %c0_10 = arith.constant 0 : index
    %c0_11 = arith.constant 0 : index
    %12 = vector.load %arg7[%c0_10, %c0_11] : memref<8x1xf32, #tpu.memory_space<vmem>>, vector<8x1xf32>
    %cst_12 = arith.constant dense<0xFF800000> : vector<8xf32>
    %13 = vector.multi_reduction <maximumf>, %11, %cst_12 [1] : vector<8x8xf32> to vector<8xf32>
    %14 = vector.shape_cast %13 : vector<8xf32> to vector<8x1xf32>
    %15 = arith.maximumf %12, %14 : vector<8x1xf32>
    %c0_13 = arith.constant 0 : index
    %c0_14 = arith.constant 0 : index
    %16 = vector.load %arg7[%c0_13, %c0_14] : memref<8x1xf32, #tpu.memory_space<vmem>>, vector<8x1xf32>
    %17 = arith.subf %16, %15 : vector<8x1xf32>
    %18 = math.exp %17 : vector<8x1xf32>
    %19 = vector.broadcast %15 : vector<8x1xf32> to vector<8x8xf32>
    %20 = arith.subf %11, %19 : vector<8x8xf32>
    %21 = math.exp %20 : vector<8x8xf32>
    %c0_15 = arith.constant 0 : index
    %c0_16 = arith.constant 0 : index
    %22 = vector.load %arg8[%c0_15, %c0_16] : memref<8x1xf32, #tpu.memory_space<vmem>>, vector<8x1xf32>
    %23 = arith.mulf %18, %22 : vector<8x1xf32>
    %cst_17 = arith.constant dense<0.000000e+00> : vector<8xf32>
    %24 = vector.multi_reduction <add>, %21, %cst_17 [1] : vector<8x8xf32> to vector<8xf32>
    %25 = vector.shape_cast %24 : vector<8xf32> to vector<8x1xf32>
    %26 = arith.addf %23, %25 : vector<8x1xf32>
    %c0_18 = arith.constant 0 : index
    %c0_19 = arith.constant 0 : index
    %27 = vector.load %arg8[%c0_18, %c0_19] : memref<8x1xf32, #tpu.memory_space<vmem>>, vector<8x1xf32>
    tpu.vector_store %arg8[%c0_18, %c0_19], %26 {strides = array<i32>} : memref<8x1xf32, #tpu.memory_space<vmem>>, vector<8x1xf32>,
    %c0_20 = arith.constant 0 : index
    %c0_21 = arith.constant 0 : index
    %28 = vector.load %arg9[%c0_20, %c0_21] : memref<8x128xf32, #tpu.memory_space<vmem>>, vector<8x128xf32>
    %29 = vector.broadcast %18 : vector<8x1xf32> to vector<8x128xf32>
    %30 = arith.mulf %29, %28 : vector<8x128xf32>
    %cst_22 = arith.constant dense<0.000000e+00> : vector<8x128xf32>
    %31 = tpu.matmul %21, %8, %cst_22 {dimension_numbers = #tpu.dot_dimension_numbers<[1], [0], [0], [1], [0, 0, 1, 1], [], []>} : vector<8x8xf32>, vector<8x128xf32>, vector<8x128xf32> -> vector<8x128xf32>
    %32 = arith.addf %30, %31 : vector<8x128xf32>
    %c0_23 = arith.constant 0 : index
    %c0_24 = arith.constant 0 : index
    %33 = vector.load %arg9[%c0_23, %c0_24] : memref<8x128xf32, #tpu.memory_space<vmem>>, vector<8x128xf32>
    tpu.vector_store %arg9[%c0_23, %c0_24], %32 {strides = array<i32>} : memref<8x128xf32, #tpu.memory_space<vmem>>, vector<8x128xf32>,
    %c0_25 = arith.constant 0 : index
    %c0_26 = arith.constant 0 : index
    %34 = vector.load %arg7[%c0_25, %c0_26] : memref<8x1xf32, #tpu.memory_space<vmem>>, vector<8x1xf32>
    tpu.vector_store %arg7[%c0_25, %c0_26], %15 {strides = array<i32>} : memref<8x1xf32, #tpu.memory_space<vmem>>, vector<8x1xf32>,
    %c0_i32_27 = arith.constant 0 : i32
    %35 = arith.cmpi eq, %arg2, %c0_i32_27 : i32
    %36 = arith.extui %35 : i1 to i32
    %c0_i32_28 = arith.constant 0 : i32
    %37 = arith.cmpi ne, %36, %c0_i32_28 : i32
    scf.if %37 {
      %c0_29 = arith.constant 0 : index
      %c0_30 = arith.constant 0 : index
      %38 = vector.load %arg9[%c0_29, %c0_30] : memref<8x128xf32, #tpu.memory_space<vmem>>, vector<8x128xf32>
      %c0_31 = arith.constant 0 : index
      %c0_32 = arith.constant 0 : index
      %39 = vector.load %arg8[%c0_31, %c0_32] : memref<8x1xf32, #tpu.memory_space<vmem>>, vector<8x1xf32>
      %40 = vector.broadcast %39 : vector<8x1xf32> to vector<8x128xf32>
      %41 = arith.divf %38, %40 : vector<8x128xf32>
      %c0_33 = arith.constant 0 : index
      %c0_34 = arith.constant 0 : index
      %c0_35 = arith.constant 0 : index
      %42 = vector.load %arg6[%c0_33, %c0_34, %c0_35] : memref<1x8x128xf32, #tpu.memory_space<vmem>>, vector<1x8x128xf32>
      %43 = vector.shape_cast %42 : vector<1x8x128xf32> to vector<8x128xf32>
      %44 = vector.shape_cast %41 : vector<8x128xf32> to vector<1x8x128xf32>
      tpu.vector_store %arg6[%c0_33, %c0_34, %c0_35], %44 {strides = array<i32>} : memref<1x8x128xf32, #tpu.memory_space<vmem>>, vector<1x8x128xf32>,
    } else {
    }
    return
  }
  func.func @transform_0(%arg0: i32, %arg1: i32, %arg2: i32) -> (i32, i32, i32) {
    %c0_i32 = arith.constant 0 : i32
    %c0_i32_0 = arith.constant 0 : i32
    return %arg0, %arg1, %c0_i32 : i32, i32, i32
  }
  func.func @transform_1(%arg0: i32, %arg1: i32, %arg2: i32) -> (i32, i32, i32) {
    %c1_i32 = arith.constant 1 : i32
    %c0_i32 = arith.constant 0 : i32
    return %arg0, %arg2, %c1_i32 : i32, i32, i32
  }
  func.func @transform_2(%arg0: i32, %arg1: i32, %arg2: i32) -> (i32, i32, i32) {
    %c2_i32 = arith.constant 2 : i32
    %c0_i32 = arith.constant 0 : i32
    return %arg0, %arg2, %c2_i32 : i32, i32, i32
  }
  func.func @transform_3(%arg0: i32, %arg1: i32, %arg2: i32) -> (i32, i32, i32) {
    %c0_i32 = arith.constant 0 : i32
    %c0_i32_0 = arith.constant 0 : i32
    return %arg0, %arg1, %c0_i32 : i32, i32, i32
  }
}

module attributes {stable_mosaic.version = 11 : i64} {
  func.func @_qkv_proj_kernel(%arg0: i32, %arg1: i32, %arg2: memref<1x8x128xf32, #tpu.memory_space<vmem>>, %arg3: memref<128x384xf32, #tpu.memory_space<vmem>>, %arg4: memref<1x384xf32, #tpu.memory_space<vmem>>, %arg5: memref<1x8x384xf32, #tpu.memory_space<vmem>>) attributes {dimension_semantics = [#tpu.dimension_semantics<parallel>, #tpu.dimension_semantics<parallel>], iteration_bounds = array<i64: 2, 1>, scalar_prefetch = 0 : i64, scratch_operands = 0 : i64, tpu.core_type = #tpu.core_type<tc>, window_params = [{transform_indices = @transform_0, window_bounds = array<i64: 1, 8, 128>}, {pipeline_mode = #tpu.pipeline_mode<synchronous>, transform_indices = @transform_1, window_bounds = array<i64: 128, 384>}, {pipeline_mode = #tpu.pipeline_mode<synchronous>, transform_indices = @transform_2, window_bounds = array<i64: 1, 384>}, {transform_indices = @transform_3, window_bounds = array<i64: 1, 8, 384>}]} {
    %c0 = arith.constant 0 : index
    %c0_0 = arith.constant 0 : index
    %c0_1 = arith.constant 0 : index
    %0 = vector.load %arg2[%c0, %c0_0, %c0_1] : memref<1x8x128xf32, #tpu.memory_space<vmem>>, vector<1x8x128xf32>
    %1 = vector.shape_cast %0 : vector<1x8x128xf32> to vector<8x128xf32>
    %c0_2 = arith.constant 0 : index
    %c0_3 = arith.constant 0 : index
    %2 = vector.load %arg3[%c0_2, %c0_3] : memref<128x384xf32, #tpu.memory_space<vmem>>, vector<128x384xf32>
    %cst = arith.constant dense<0.000000e+00> : vector<8x384xf32>
    %3 = tpu.matmul %1, %2, %cst {dimension_numbers = #tpu.dot_dimension_numbers<[1], [0], [0], [1], [0, 0, 1, 1], [], []>} : vector<8x128xf32>, vector<128x384xf32>, vector<8x384xf32> -> vector<8x384xf32>
    %c0_4 = arith.constant 0 : index
    %c0_5 = arith.constant 0 : index
    %4 = vector.load %arg4[%c0_4, %c0_5] : memref<1x384xf32, #tpu.memory_space<vmem>>, vector<1x384xf32>
    %5 = vector.broadcast %4 : vector<1x384xf32> to vector<8x384xf32>
    %6 = arith.addf %3, %5 : vector<8x384xf32>
    %c0_6 = arith.constant 0 : index
    %c0_7 = arith.constant 0 : index
    %c0_8 = arith.constant 0 : index
    %7 = vector.load %arg5[%c0_6, %c0_7, %c0_8] : memref<1x8x384xf32, #tpu.memory_space<vmem>>, vector<1x8x384xf32>
    %8 = vector.shape_cast %7 : vector<1x8x384xf32> to vector<8x384xf32>
    %9 = vector.shape_cast %6 : vector<8x384xf32> to vector<1x8x384xf32>
    tpu.vector_store %arg5[%c0_6, %c0_7, %c0_8], %9 {strides = array<i32>} : memref<1x8x384xf32, #tpu.memory_space<vmem>>, vector<1x8x384xf32>,
    return
  }
  func.func @transform_0(%arg0: i32, %arg1: i32) -> (i32, i32, i32) {
    %c0_i32 = arith.constant 0 : i32
    %c0_i32_0 = arith.constant 0 : i32
    return %arg0, %arg1, %c0_i32 : i32, i32, i32
  }
  func.func @transform_1(%arg0: i32, %arg1: i32) -> (i32, i32) {
    %c0_i32 = arith.constant 0 : i32
    %c0_i32_0 = arith.constant 0 : i32
    %c0_i32_1 = arith.constant 0 : i32
    return %c0_i32, %c0_i32_0 : i32, i32
  }
  func.func @transform_2(%arg0: i32, %arg1: i32) -> (i32, i32) {
    %c0_i32 = arith.constant 0 : i32
    %c0_i32_0 = arith.constant 0 : i32
    %c0_i32_1 = arith.constant 0 : i32
    return %c0_i32, %c0_i32_0 : i32, i32
  }
  func.func @transform_3(%arg0: i32, %arg1: i32) -> (i32, i32, i32) {
    %c0_i32 = arith.constant 0 : i32
    %c0_i32_0 = arith.constant 0 : i32
    return %arg0, %arg1, %c0_i32 : i32, i32, i32
  }
}

</mosaic_0001>

<bundles_post_ra>
// kernel: attention_pallas_fused.3
= control target key start
LH: loop header
LB: loop body
LE: loop exit
PB: predicated region body
PF: predicated region fallthrough
CT: control target
= control target key end

     0   :  { %8 = vsyncpa [#allocation6], 0  ;;  %s952_s0 = inlined_call_operand.vmem [shape: f32[2,8,384], index: 0, kind: input, shape index: {}, may-alias: {0,1,2}]   ;;  %s953_s1 = inlined_call_operand.vmem [shape: f32[2,8,384], index: 1, kind: input, shape index: {}, may-alias: {0,1,2}]   ;;  %s954_s2 = inlined_call_operand.vmem [shape: f32[2,8,384], index: 2, kind: input, shape index: {}, may-alias: {0,1,2}]   ;;  %s955_s3 = inlined_call_operand.hbm [shape: f32[2,8,128], index: 3, kind: output, shape index: {}]  }
   0x1   :  { %10 = vsyncpa [#allocation6 + $0x1], 0  ;;  %s827_s12 = smov 0   ;;  %s829_s13 = smov 0  }
   0x2   :  { %s831_s14 = smov 0   ;;  %s833_s15 = smov 0  }
   0x3   :  { %s835_s16 = smov 0   ;;  %s837_s17 = smov 0  }
   0x4 LB: > { %s624_s18 = sadd.s32 4294967295, %s800_s17   ;;  %s625_s19 = sadd.s32 4294967294, %s800_s17   ;;  %s800_s17 = sphi %s837_s17, %s16_s17   ;;  %s796_s16 = sphi %s835_s16, %s962_s16   ;;  %s792_s15 = sphi %s833_s15, %s961_s15   ;;  %s788_s14 = sphi %s831_s14, %s960_s14   ;;  %s784_s13 = sphi %s829_s13, %s959_s13   ;;  %s780_s12 = sphi %s827_s12, %s958_s12  }
   0x5   : > { %s35_s20 = sadd.s32 1, %s796_s16  ;;  %s128_s21 = sadd.s32 1, %s788_s14 }
   0x6   : > { %p37_p0 = scmp.ge.s32.totalorder %s35_s20, 2  ;;  %p138_p1 = scmp.ne.s32.totalorder %s788_s14, %s784_s13 }
   0x7   : > { %p139_p2 = scmp.eq.s32.totalorder %s624_s18, 1  ;;  %p144_p3 = scmp.ne.s32.totalorder %s784_s13, %s780_s12 }
   0x8   : > { %s964_s20 = smov (%p37_p0, %s35_s20), 0  ;;  %p145_p5 = scmp.eq.s32.totalorder %s625_s19, 1 }
   0x9   : > { %p867_p4 = por %p139_p2, %p138_p1  ;;  %s123_s23 = ssub.s32 %s796_s16, %s964_s20 }
   0xa   : > { %p628_p6 = scmp.ge.s32.totalorder %s800_s17, 1  ;;  %p126_p7 = scmp.eq.s32.totalorder %s123_s23, 0 }
   0xb   : > { %p874_p8 = por %p145_p5, %p144_p3  ;;  %p201_p9 = scmp.lt.s32.totalorder %s800_s17, 3 }
   0xc   : > { %s880_s25 = scalar_select %p126_p7, %s788_s14, %s128_s21  }
   0xd   : > { %p202_p10 = pnand %p628_p6, %p201_p9 }
   0xe   : > { %p249_p11 = scmp.lt.s32.totalorder (!%p202_p10), %s792_s15, 1  ;;  %v802_v0 = vmov (!%p202_p10), 0.0   ;;  %vm803_vm0 = vmmov (!%p202_p10), 0   ;;  %vm282_vm1 = vcmask (!%p202_p10), 7168   ;;  %v804_v3 = vmov (!%p202_p10), -inf   ;;  %s246_s10 = sand.u32 (!%p202_p10), 1, %s784_s13  }
   0xf   : > { %205 = sbr.rel (%p202_p10) target bundleno = 841 (0x349), region = 32  ;;  %644 = vmatprep.subr.mxu0 (!%p202_p10), %v802_v0  ;;  %646 = vmatprep.mubr.msk.f32.mxu0 (!%p202_p10), %vm803_vm0, %v802_v0  ;;  %283 = vst.msk [vmem:[#allocation2] sm:$0xff] (!%p202_p10), %vm282_vm1, %v804_v3  ;;  %284 = vst.msk [vmem:[#allocation3] sm:$0xff] (!%p202_p10), %vm282_vm1, %v802_v0  ;;  %vm361_vm2 = vcmask (!%p202_p10), 64512   ;;  %v805_v8 = vmov (!%p202_p10), 0   ;;  %s629_s11 = sshll.u32 (!%p202_p10), %s246_s10, 3 }
  0x10   : > { %649 = vmatprep.subr.mxu1 (!%p202_p10), %v802_v0  ;;  %651 = vmatprep.mubr.msk.f32.mxu1 (!%p202_p10), %vm803_vm0, %v802_v0  ;;  %s637_s18 = sshll.u32 (!%p202_p10), %s792_s15, 7  ;;  %s248_s19 = scalar_lea.vmem (!%p202_p10), [#allocation5], %s629_s11 }
  0x11   : > { %714 = vset.pattern.permute.xlu0 (!%p202_p10), %v805_v8  ;;  %715 = vset.pattern.permute.xlu1 (!%p202_p10), %v805_v8  ;;  %s496_s21 = sshll.u32 (!%p202_p10), %s248_s19, 4  ;;  %s482_s28 = scalar_lea.sflag (!%p202_p10), [#allocation6], %s246_s10  ;;  %s907_s21 = int_to_ptr.vmem [resolvable:$true] %s496_s21 }
  0x12   : > { %s722_s29 = scalar_lea.vmem (!%p202_p10), %s907_s21, 128 }
  0x13   : > { %p723_p12 = scmp.ne.s32.totalorder (!%p202_p10), %s907_s21, %s722_s29 }
  0x15   : > { %p724_p13 = pnand (!%p202_p10), %p723_p12, %p867_p4 }
  0x16   : > { %s250_s26 = scalar_select %p249_p11, %s792_s15, 1  ;;  %v360_v9 = vld [vmem:[#allocation2] sm:$0xff]  ;;  %v377_v21 = vld [vmem:[#allocation3] sm:$0xff] }
  0x17   : > { %p725_p0 = pneg %p724_p13  ;;  %s806_s15 = smov [#allocation5]  }
  0x18   : > { %s654_s27 = smul.u32 24, %s250_s26 }
  0x1a   : > { %s563_s30 = scalar_lea.vmem %s953_s1, %s654_s27  ;;  %s257_s6 = scalar_lea.vmem %s952_s0, %s654_s27 }
  0x1b   : > { %v633_v1 = vld [vmem:[%s563_s30 + $0x8] sm:$0xff]  ;;  %v286_v2 = vld [vmem:[%s257_s6] sm:$0xff]  ;;  %s569_s9 = scalar_lea.vmem %s954_s2, %s654_s27  ;;  %s905_s27 = scalar_lea.hbm %s955_s3, %s637_s18 }
  0x1c   : > { %645 = vmatpush3.xpose.msra.mxu0 %v633_v1  ;;  %v634_v13 = vld [vmem:[%s569_s9 + $0x10] sm:$0xff]  ;;  %s726_s30 = sshll.u32 %s806_s15, 4  ;;  %s727_s30 = int_to_ptr.vmem [resolvable:$false] %s726_s30 }
  0x1d   : > { %650 = vmatpush3.msra.mxu1 %v634_v13  ;;  %s728_s4 = scalar_lea.vmem %s727_s30, 256  ;;  %p729_p1 = scmp.lt.s32.totalorder %s907_s21, %s727_s30 }
  0x1e   : > { %p730_p2 = scmp.lt.s32.totalorder %s728_s4, %s722_s29 }
  0x1f   : > { %647 = vmatmul.mubr.f32.vlgmr.msra.gmra.mrb[0].mxu0 %v286_v2 }
  0x20   : > { %p731_p3 = por %p730_p2, %p729_p1 }
  0x22   : > { %p732_p5 = pnand %p731_p3, %p725_p0 }
  0xf2   : > { %v355_v4 = vpop.f32.mrb[0].mxu0 }
  0xf3   : > { %v359_v5 = vmul.f32 0.17677669, %v355_v4  ;;  %v648_v6 = vpop.f32.mrb[1].mxu0 }
  0xf5   : > { %v362_v7 = vsel %vm361_vm2, %v359_v5, -inf }
  0xf6   : > { %363 = vmax.xlane.f32.xlu0 %v362_v7 }
 0x183   : > { %v364_v10 = vpop.xlane.xlu0 %363 }
 0x184   : > { %v365_v11 = vmax.f32 %v360_v9, %v364_v10 }
 0x186   : > { %v366_v12 = vsub.f32 %v360_v9, %v365_v11  ;;  %467 = vst.msk [vmem:[#allocation2] sm:$0xff] %vm282_vm1, %v365_v11  ;;  %371 = vperm.xlu0 %714, %v365_v11  }
 0x188   : > { %v367_v19 = vmul.f32 1.442695, %v366_v12 }
 0x205   : > { %v372_v14 = vpop.permute.xlu0 %371 }
 0x206   : > { %v374_v15 = vsub.f32 %v359_v5, %v372_v14 }
 0x208   : > { %v375_v16 = vmul.f32 1.442695, %v374_v15 }
 0x20a   : > { %716 = vpow2.f32 %v375_v16 }
 0x20b   : > { %718 = vpow2.f32 %v367_v19 }
 0x214   : > { %v717_v17 = vpop.eup %716 }
 0x215   : > { %652 = vmatmul.mubr.msk.f32.vlgmr.msra.gmra.mrb[0].mxu1 %vm361_vm2, %v717_v17  ;;  %v379_v18 = vsel %vm361_vm2, %v717_v17, 0.0  ;;  %v719_v20 = vpop.eup %718 }
 0x216   : > { %380 = vadd.xlane.f32.xlu1 %v379_v18  ;;  %v378_v22 = vmul.f32 %v719_v20, %v377_v21 }
 0x2a3   : > { %v381_v23 = vpop.xlane.xlu1 %380 }
 0x2a4   : > { %v382_v24 = vadd.f32 %v381_v23, %v378_v22 }
 0x2a6   : > { %384 = vst.msk [vmem:[#allocation3] sm:$0xff] %vm282_vm1, %v382_v24 }
 0x2ad   : > { %v472_v25 = vld [vmem:[#allocation3] sm:$0xff] }
 0x2ae   : > { %475 = vperm.xlu1 %715, %v472_v25  }
 0x2b2   : > { %388 = vperm.xlu1 %715, %v719_v20  }
 0x2e8   : > { %v461_v26 = vpop.f32.mrb[0].mxu1 }
 0x2e9   : > { %v653_v27 = vpop.f32.mrb[1].mxu1 }
 0x32d   : > { %v476_v28 = vpop.permute.xlu1 %475 }
 0x32e   : > { %720 = vrcp.f32 %v476_v28 }
 0x331   : > { %v389_v29 = vpop.permute.xlu1 %388 }
 0x332   : > { %v391_v30 = vmul.f32 0.0, %v389_v29 }
 0x334   : > { %v465_v31 = vadd.f32 %v461_v26, %v391_v30 }
 0x338   : > { %v721_v32 = vpop.eup %720 }
 0x339   : > { %v479_v33 = vmul.f32 %v721_v32, %v465_v31 }
 0x33b   : > { %480 = vst [vmem:[%s248_s19] sm:$0xff] %v479_v33 }
 0x33c   : > { %735 = shalt.err (!%p732_p5)
}
 0x33d   : > { %s736_s5 = scalar_lea.hbm %s905_s27, 128  ;;  %s740_s8 = scalar_lea.hbm %s955_s3, 256 }
 0x33e   : > { %p737_p6 = scmp.ne.s32.totalorder %s905_s27, %s736_s5  ;;  %p741_p10 = scmp.lt.u32.totalorder %s905_s27, %s955_s3 }
 0x33f   : > { %p742_p11 = scmp.lt.u32.totalorder %s740_s8, %s736_s5  ;;  %p744_p13 = scmp.lt.u32.totalorder %s736_s5, %s905_s27 }
 0x340   : > { %p738_p7 = pnand %p737_p6, %p867_p4 }
 0x341   : > { %p743_p12 = por %p742_p11, %p741_p10 }
 0x342   : > { %p739_p9 = pneg %p738_p7 }
 0x343   : > { %p745_p0 = por %p744_p13, %p743_p12 }
 0x345   : > { %p746_p1 = pnand %p745_p0, %p739_p9 }
 0x347   : > { %749 = shalt.err (!%p746_p1)
}
 0x348   : > { %655 = dma.vmem_to_hbm [thread:$0]  (%p867_p4), %s907_s21, 128, %s905_s27, %s482_s28  }
 0x349 PF: > { %p661_p2 = scmp.ge.s32.totalorder %s800_s17, 2  ;;  %s508_s11 = sand.u32 1, %s780_s12  }
 0x34a   : > { %s509_s18 = scalar_lea.sflag [#allocation6], %s508_s11 }
 0x34b   : > { %p658_p3 = pnand %p661_p2, %p874_p8 }
 0x34d   : > { %775 = dma.done.wait (!%p658_p3), %s509_s18, 128  }
 0x34e   : > { %777 = vsyncadd (!%p658_p3), %s509_s18, 4294967168  ;;  %s16_s17 = sadd.s32 1, %s800_s17   ;;  %s958_s12 = smov %s784_s13 }
 0x34f   : > { %p13_p5 = scmp.ge.s32.totalorder %s16_s17, 4   ;;  %s959_s13 = smov %s788_s14 }
 0x350   : > { %s960_s14 = smov %s880_s25  ;;  %s961_s15 = smov %s796_s16 }
 0x351   : > { %s962_s16 = smov %s964_s20  ;;  %15 = sbr.rel (!%p13_p5) target bundleno = 4 (0x4), region = 81 }
 0x358   :  { %514 = vsyncpa [#allocation6], 1 }
 0x359   :  { %516 = vsyncpa [#allocation6 + $0x1], 1 }

// kernel: attention_pallas_fused.2
= control target key start
LH: loop header
LB: loop body
LE: loop exit
PB: predicated region body
PF: predicated region fallthrough
CT: control target
= control target key end

     0   :  { %8 = vsyncpa [#allocation3], 0  ;;  %s767_s12 = smov 0   ;;  %s769_s13 = smov 0   ;;  %s860_s0 = inlined_call_operand.vmem [shape: f32[2,8,128], index: 0, kind: input, shape index: {}]   ;;  %s861_s1 = inlined_call_operand.hbm [shape: f32[128,384], index: 1, kind: input, shape index: {}]   ;;  %s862_s2 = inlined_call_operand.vmem [shape: f32[1,384], index: 2, kind: input, shape index: {}]   ;;  %s863_s3 = inlined_call_operand.vmem [shape: f32[2,8,384], index: 3, kind: output, shape index: {}]  }
   0x1   :  { %s771_s14 = smov 0  }
   0x2 LB: > { %s525_s15 = sadd.s32 4294967295, %s739_s14   ;;  %s26_s16 = sadd.s32 1, %s735_s13  ;;  %s739_s14 = sphi %s771_s14, %s14_s14   ;;  %s735_s13 = sphi %s769_s13, %s873_s13   ;;  %s731_s12 = sphi %s767_s12, %s872_s12  }
   0x3   : > { %p28_p0 = scmp.ge.s32.totalorder %s26_s16, 2  ;;  %p527_p1 = scmp.ge.s32.totalorder %s739_s14, 1 }
   0x4   : > { %p129_p2 = scmp.lt.s32.totalorder %s739_s14, 3  ;;  %p792_p4 = scmp.eq.s32.totalorder %s525_s15, 0 }
   0x5   : > { %s875_s16 = smov (%p28_p0, %s26_s16), 0  ;;  %s741_s19 = smov [#allocation2]  }
   0x6   : > { %p788_p3 = pnand %p527_p1, %p129_p2  ;;  %s141_s20 = sshll.u32 %s741_s19, 4  ;;  %s142_s20 = int_to_ptr.vmem [resolvable:$true] %s141_s20 }
   0x7   : > { %s868_s18 = scalar_select %p792_p4, 1, 0 }
   0x8   : > { %s867_s17 = scalar_select %p788_p3, 1, 0 }
   0x9   : > { %p649_p5 = pneg %p788_p3  ;;  %s685_s24 = scalar_lea.hbm %s861_s1, 6144 }
   0xa   : > { %p686_p7 = scmp.ne.s32.totalorder %s861_s1, %s685_s24  ;;  %p692_p11 = scmp.lt.u32.totalorder %s685_s24, %s861_s1 }
   0xb   : > { %p800_p6 = pnand %p792_p4, %p649_p5 }
   0xd   : > { %p687_p8 = pneg %p800_p6 }
   0xf   : > { %p688_p9 = pnand %p687_p8, %p686_p7 }
  0x11   : > { %p689_p10 = pneg %p688_p9 }
  0x13   : > { %p694_p12 = pnand %p692_p11, %p689_p10 }
  0x15   : > { %697 = shalt.err (!%p694_p12)
}
  0x16   : > { %s698_s29 = scalar_lea.vmem %s142_s20, 6144  ;;  %p706_p2 = scmp.lt.s32.totalorder %s142_s20, %s142_s20 }
  0x17   : > { %p699_p13 = scmp.ne.s32.totalorder %s142_s20, %s698_s29  ;;  %p707_p5 = scmp.lt.s32.totalorder %s698_s29, %s698_s29 }
  0x19   : > { %p701_p0 = pnand %p699_p13, %p687_p8  ;;  %p708_p4 = por %p707_p5, %p706_p2 }
  0x1b   : > { %p702_p1 = pneg %p701_p0 }
  0x1d   : > { %p709_p3 = pnand %p708_p4, %p702_p1 }
  0x1f   : > { %712 = shalt.err (!%p709_p3)
}
  0x20   : > { %s742_s30 = smov 384   ;;  %s743_s4 = smov 24  }
  0x21   : > { %652 = dma.hbm_to_vmem [thread:$0]  (!%p800_p6), %s861_s1, 6144, %s142_s20, [#allocation3], %s742_s30, %s742_s30, %s743_s4  }
  0x22   : > { %p870_p7 = scmp.ne.s32.totalorder %s867_s17, 0 }
  0x23   : > { %p871_p9 = scmp.ne.s32.totalorder (!%p870_p7), %s868_s18, 0 }
  0x24   : > { %170 = sbr.rel (%p870_p7) target bundleno = 296 (0x128), region = 32 }
  0x2b   : > { %726 = dma.done.wait (%p871_p9), [#allocation3], 6144  }
  0x2c   : > { %728 = vsyncadd (%p871_p9), [#allocation3], 4294961152  ;;  %v744_v0 = vmov 0.0|0.0   ;;  %v745_v1 = vmov 0.0   ;;  %vm746_vm0 = vmmov 0   ;;  %v218_v2 = vld [vmem:[#allocation2 + $0x8] sm:$0xff] }
  0x2d   : > { %620 = vmatprep.subr.bf16.mxu1 %v744_v0  ;;  %346 = vmatprep.mubr.f32.mxu0 %v745_v1  ;;  %v221_v3 = vld [vmem:[#allocation2 + $0x20] sm:$0xff]  ;;  %v220_v6 = vld [vmem:[#allocation2 + $0x18] sm:$0xff]  ;;  %v219_v7 = vld [vmem:[#allocation2 + $0x10] sm:$0xff]  ;;  %p200_p3 = scmp.lt.s32.totalorder %s731_s12, 1 }
  0x2e   : > { %585 = vmatprep.mubr.msk.f32.mxu1 %vm746_vm0, %v745_v1  ;;  %v217_v4 = vld [vmem:[#allocation2] sm:$0xff]  ;;  %v588_v5 = vpack.c.bf16 %v221_v3, %v218_v2  ;;  %v222_v8 = vld [vmem:[#allocation2 + $0x28] sm:$0xff]  ;;  %v224_v11 = vld [vmem:[#allocation2 + $0x38] sm:$0xff] }
  0x2f   : > { %v590_v9 = vpack.c.bf16 %v220_v6, %v217_v4  ;;  %v621_v10 = vpack.c.bf16 %v222_v8, %v219_v7  ;;  %v227_v12 = vld [vmem:[#allocation2 + $0x50] sm:$0xff]  ;;  %v226_v15 = vld [vmem:[#allocation2 + $0x48] sm:$0xff]  ;;  %v225_v16 = vld [vmem:[#allocation2 + $0x40] sm:$0xff]  ;;  %s877_s12 = smov (!%p200_p3, %s731_s12), 1 }
  0x30   : > { %v223_v13 = vld [vmem:[#allocation2 + $0x30] sm:$0xff]  ;;  %589 = vmatprep.subr.bf16.mxu0 %v588_v5  ;;  %v592_v14 = vpack.c.bf16 %v227_v12, %v224_v11  ;;  %v228_v17 = vld [vmem:[#allocation2 + $0x58] sm:$0xff]  ;;  %v230_v20 = vld [vmem:[#allocation2 + $0x68] sm:$0xff]  ;;  %s532_s7 = sshll.u32 %s877_s12, 3  ;;  %v267_v12 = vlaneseq  ;;  %s644_s17 = smul.u32 24, %s877_s12 }
  0x31   : > { %591 = vmatpush1.bf16.msra.mxu0 %v590_v9  ;;  %622 = vmatpush3.bf16.msra.mxu1 %v621_v10  ;;  %v594_v18 = vpack.c.bf16 %v226_v15, %v223_v13  ;;  %v624_v19 = vpack.c.bf16 %v228_v17, %v225_v16  ;;  %v233_v21 = vld [vmem:[#allocation2 + $0x80] sm:$0xff]  ;;  %v232_v24 = vld [vmem:[#allocation2 + $0x78] sm:$0xff]  ;;  %v231_v25 = vld [vmem:[#allocation2 + $0x70] sm:$0xff]  ;;  %s206_s10 = scalar_lea.vmem %s860_s0, %s532_s7 }
  0x32   : > { %v229_v22 = vld [vmem:[#allocation2 + $0x60] sm:$0xff]  ;;  %593 = vmatprep.subr.bf16.mxu0 %v592_v14  ;;  %623 = vmatprep.subr.bf16.mxu1 %v744_v0  ;;  %v596_v23 = vpack.c.bf16 %v233_v21, %v230_v20  ;;  %v234_v26 = vld [vmem:[#allocation2 + $0x88] sm:$0xff]  ;;  %v236_v27 = vld [vmem:[#allocation2 + $0x98] sm:$0xff]  ;;  %v268_v13 = vshrl.u32 %v267_v12, 7  ;;  %s215_s20 = scalar_lea.vmem %s863_s3, %s644_s17 }
  0x33   : > { %v239_v28 = vld [vmem:[#allocation2 + $0xb0] sm:$0xff]  ;;  %v598_v29 = vpack.c.bf16 %v232_v24, %v229_v22  ;;  %v627_v30 = vpack.c.bf16 %v234_v26, %v231_v25  ;;  %v238_v33 = vld [vmem:[#allocation2 + $0xa8] sm:$0xff]  ;;  %v237_v34 = vld [vmem:[#allocation2 + $0xa0] sm:$0xff] }
  0x34   : > { %v235_v31 = vld [vmem:[#allocation2 + $0x90] sm:$0xff]  ;;  %v600_v32 = vpack.c.bf16 %v239_v28, %v236_v27  ;;  %v240_v35 = vld [vmem:[#allocation2 + $0xb8] sm:$0xff]  ;;  %v242_v36 = vld [vmem:[#allocation2 + $0xc8] sm:$0xff]  ;;  %v269_v14 = vsub.s32 0, %v268_v13  ;;  %v277_v15 = vsub.s32 2, %v268_v13  ;;  %v273_v17 = vsub.s32 1, %v268_v13 }
  0x35   : > { %595 = vmatpush1.bf16.msra.mxu0 %v594_v18  ;;  %625 = vmatpush3.bf16.msra.mxu1 %v624_v19  ;;  %v245_v37 = vld [vmem:[#allocation2 + $0xe0] sm:$0xff]  ;;  %v602_v38 = vpack.c.bf16 %v238_v33, %v235_v31  ;;  %v630_v39 = vpack.c.bf16 %v240_v35, %v237_v34  ;;  %v244_v42 = vld [vmem:[#allocation2 + $0xd8] sm:$0xff]  ;;  %v243_v43 = vld [vmem:[#allocation2 + $0xd0] sm:$0xff] }
  0x36   : > { %597 = vmatprep.subr.bf16.mxu0 %v596_v23  ;;  %626 = vmatprep.subr.bf16.mxu1 %v744_v0  ;;  %v241_v40 = vld [vmem:[#allocation2 + $0xc0] sm:$0xff]  ;;  %v604_v41 = vpack.c.bf16 %v245_v37, %v242_v36  ;;  %v246_v44 = vld [vmem:[#allocation2 + $0xe8] sm:$0xff]  ;;  %v248_v45 = vld [vmem:[#allocation2 + $0xf8] sm:$0xff] }
  0x37   : > { %v251_v46 = vld [vmem:[#allocation2 + $0x110] sm:$0xff]  ;;  %v606_v47 = vpack.c.bf16 %v244_v42, %v241_v40  ;;  %v633_v48 = vpack.c.bf16 %v246_v44, %v243_v43  ;;  %v250_v51 = vld [vmem:[#allocation2 + $0x108] sm:$0xff]  ;;  %v249_v52 = vld [vmem:[#allocation2 + $0x100] sm:$0xff] }
  0x38   : > { %v247_v49 = vld [vmem:[#allocation2 + $0xf0] sm:$0xff]  ;;  %v608_v50 = vpack.c.bf16 %v251_v46, %v248_v45  ;;  %v252_v53 = vld [vmem:[#allocation2 + $0x118] sm:$0xff]  ;;  %v254_v54 = vld [vmem:[#allocation2 + $0x128] sm:$0xff] }
  0x39   : > { %599 = vmatpush1.bf16.msra.mxu0 %v598_v29  ;;  %628 = vmatpush3.bf16.msra.mxu1 %v627_v30  ;;  %v257_v55 = vld [vmem:[#allocation2 + $0x140] sm:$0xff]  ;;  %v610_v56 = vpack.c.bf16 %v250_v51, %v247_v49  ;;  %v636_v57 = vpack.c.bf16 %v252_v53, %v249_v52  ;;  %v256_v60 = vld [vmem:[#allocation2 + $0x138] sm:$0xff]  ;;  %v255_v61 = vld [vmem:[#allocation2 + $0x130] sm:$0xff] }
  0x3a   : > { %601 = vmatprep.subr.bf16.mxu0 %v600_v32  ;;  %629 = vmatprep.subr.bf16.mxu1 %v744_v0  ;;  %v253_v58 = vld [vmem:[#allocation2 + $0x120] sm:$0xff]  ;;  %v612_v59 = vpack.c.bf16 %v257_v55, %v254_v54  ;;  %v258_v62 = vld [vmem:[#allocation2 + $0x148] sm:$0xff]  ;;  %v260_v63 = vld [vmem:[#allocation2 + $0x158] sm:$0xff] }
  0x3b   : > { %v263_v1 = vld [vmem:[#allocation2 + $0x170] sm:$0xff]  ;;  %v614_v2 = vpack.c.bf16 %v256_v60, %v253_v58  ;;  %v639_v3 = vpack.c.bf16 %v258_v62, %v255_v61  ;;  %v262_v6 = vld [vmem:[#allocation2 + $0x168] sm:$0xff]  ;;  %v261_v7 = vld [vmem:[#allocation2 + $0x160] sm:$0xff] }
  0x3c   : > { %v259_v4 = vld [vmem:[#allocation2 + $0x150] sm:$0xff]  ;;  %v616_v5 = vpack.c.bf16 %v263_v1, %v260_v63  ;;  %v264_v8 = vld [vmem:[#allocation2 + $0x178] sm:$0xff]  ;;  %v216_v11 = vld [vmem:[%s206_s10] sm:$0xff] }
  0x3d   : > { %603 = vmatpush1.bf16.msra.mxu0 %v602_v38  ;;  %631 = vmatpush3.bf16.msra.mxu1 %v630_v39  ;;  %v618_v9 = vpack.c.bf16 %v262_v6, %v259_v4  ;;  %v642_v10 = vpack.c.bf16 %v264_v8, %v261_v7  ;;  %v265_v16 = vld [vmem:[%s862_s2] sm:$0x7] }
  0x3e   : > { %605 = vmatprep.subr.bf16.mxu0 %v604_v41  ;;  %632 = vmatprep.subr.bf16.mxu1 %v744_v0  ;;  %v278_v18 = vrot.slane %v265_v16, %v277_v15  ;;  %v274_v19 = vrot.slane %v265_v16, %v273_v17 }
  0x41   : > { %607 = vmatpush1.bf16.msra.mxu0 %v606_v47  ;;  %634 = vmatpush3.bf16.msra.mxu1 %v633_v48 }
  0x42   : > { %609 = vmatprep.subr.bf16.mxu0 %v608_v50  ;;  %635 = vmatprep.subr.bf16.mxu1 %v744_v0 }
  0x45   : > { %611 = vmatpush1.bf16.msra.mxu0 %v610_v56  ;;  %637 = vmatpush3.bf16.msra.mxu1 %v636_v57 }
  0x46   : > { %613 = vmatprep.subr.bf16.mxu0 %v612_v59  ;;  %638 = vmatprep.subr.bf16.mxu1 %v744_v0 }
  0x49   : > { %615 = vmatpush1.bf16.msra.mxu0 %v614_v2  ;;  %640 = vmatpush3.bf16.msra.mxu1 %v639_v3 }
  0x4a   : > { %617 = vmatprep.subr.bf16.mxu0 %v616_v5  ;;  %641 = vmatprep.subr.bf16.mxu1 %v744_v0  ;;  %v270_v0 = vrot.slane %v265_v16, %v269_v14 }
  0x4d   : > { %619 = vmatpush1.bf16.msra.mxu0 %v618_v9  ;;  %643 = vmatpush3.bf16.msra.mxu1 %v642_v10 }
  0x50   : > { %347 = vmatmul.mubr.f32.vlgmr.msra.gmra.mrb[0].mxu0 %v216_v11  ;;  %586 = vmatmul.mubr.f32.vlgmr.msra.gmra.mrb[0].mxu1 %v216_v11 }
 0x123   : > { %v348_v20 = vpop.f32.mrb[0].mxu0  ;;  %v419_v21 = vpop.f32.mrb[0].mxu1 }
 0x124   : > { %v349_v22 = vadd.f32 %v348_v20, %v270_v0  ;;  %v420_v23 = vadd.f32 %v419_v21, %v278_v18  ;;  %v350_v24 = vpop.f32.mrb[1].mxu0  ;;  %v587_v25 = vpop.f32.mrb[1].mxu1 }
 0x125   : > { %v351_v26 = vadd.f32 %v350_v24, %v274_v19 }
 0x126   : > { %423 = vst [vmem:[%s215_s20] sm:$0xff] %v349_v22  ;;  %425 = vst [vmem:[%s215_s20 + $0x10] sm:$0xff] %v420_v23 }
 0x127   : > { %424 = vst [vmem:[%s215_s20 + $0x8] sm:$0xff] %v351_v26 }
 0x128 PF: > { %s14_s14 = sadd.s32 1, %s739_s14   ;;  %s872_s12 = smov %s735_s13 }
 0x129   : > { %p11_p4 = scmp.ge.s32.totalorder %s14_s14, 4   ;;  %s873_s13 = smov %s875_s16 }
 0x12b   :  { %13 = sbr.rel (!%p11_p4) target bundleno = 2 (0x2), region = 67 }
 0x132   :  { %455 = vsyncpa [#allocation3], 1 }
 0x133   :  { %457 = vsyncpa [#allocation3 + $0x1], 1 }

</bundles_post_ra>
